<compile_context>
chip_gen: v7x
topology: tpu7x:2x2x1
jax: 0.10.0
libtpu: 0.0.40
codegen_flags: <defaults>
</compile_context>

<pallas_src>
import jax
import jax.numpy as jnp
from jax.experimental import pallas as pl
from jax.experimental.pallas import tpu as pltpu

_LANES = 128
_MAX_TILE_ROWS = 512          # 512 x 128 f32 = 256 KiB per input per buffer
_MIN_PALLAS_ELEMS = _LANES    # below this, plain jnp is strictly faster


def _round_up(x, m):
    return ((x + m - 1) // m) * m


def _reference_jnp(y_pred, y_true):
    """Plain-JAX equivalent of TemperatureAccuracy10.forward (f32 accumulation)."""
    yp = y_pred.astype(jnp.float32)
    yt = y_true.astype(jnp.float32)
    error = jnp.abs(yp - yt) / yt
    return (1.0 - jnp.mean((error > 0.1).astype(jnp.float32))).astype(jnp.float32)


def _make_kernel(inv_b):
    def _temp_acc_kernel(yp_ref, yt_ref, out_ref):
        i = pl.program_id(0)

        @pl.when(i == 0)
        def _init():
            out_ref[...] = jnp.zeros_like(out_ref)

        # Upcast inside the kernel (free VPU slack) so bf16/f16 inputs stream
        # at native width through HBM.
        yp = yp_ref[...].astype(jnp.float32)
        yt = yt_ref[...].astype(jnp.float32)
        error = jnp.abs(yp - yt) / yt
        # single compare + cast instead of where(ones, zeros); accumulate a
        # running count into the VMEM-resident (1,1) output block.
        out_ref[...] += jnp.sum((error > 0.1).astype(jnp.float32))

        @pl.when(i == pl.num_programs(0) - 1)
        def _finalize():
            out_ref[...] = 1.0 - out_ref[...] * inv_b

    return _temp_acc_kernel


def temperature_accuracy10(y_pred, y_true):
    """Pallas equivalent of TemperatureAccuracy10.forward. Returns a scalar f32."""
    assert y_pred.shape == y_true.shape and y_pred.ndim == 1
    b = y_pred.shape[0]

    # Tiny-batch fast path: pallas_call launch overhead dwarfs 8 elements of work.
    if b < _MIN_PALLAS_ELEMS:
        return _reference_jnp(y_pred, y_true)

    rows = pl.cdiv(b, _LANES)
    tile_rows = _MAX_TILE_ROWS if rows >= _MAX_TILE_ROWS else _round_up(rows, 8)
    padded_rows = _round_up(rows, tile_rows)
    padded_b = padded_rows * _LANES

    if padded_b != b:
        pad = padded_b - b
        # Pad both with 1.0 -> error = 0 -> indicator = 0 (no masking needed).
        y_pred = jnp.pad(y_pred, (0, pad), constant_values=1)
        y_true = jnp.pad(y_true, (0, pad), constant_values=1)

    yp2 = y_pred.reshape(padded_rows, _LANES)
    yt2 = y_true.reshape(padded_rows, _LANES)

    grid = (padded_rows // tile_rows,)
    kernel = _make_kernel(1.0 / float(b))  # divide by the TRUE batch size

    # TODO(synk): on v7x, a leading size-2 "parallel" axis (or core_map) with
    # two partial counts combined in the wrapper would use both TensorCores.
    out = pl.pallas_call(
        kernel,
        out_shape=jax.ShapeDtypeStruct((1, 1), jnp.float32),
        grid=grid,
        in_specs=[
            pl.BlockSpec((tile_rows, _LANES), lambda i: (i, 0)),
            pl.BlockSpec((tile_rows, _LANES), lambda i: (i, 0)),
        ],
        out_specs=pl.BlockSpec((1, 1), lambda i: (0, 0)),
        compiler_params=pltpu.CompilerParams(
            dimension_semantics=("arbitrary",)),
    )(yp2, yt2)
    return out[0, 0]


if __name__ == "__main__":
    key = jax.random.PRNGKey(0)
    k1, k2, k3, k4 = jax.random.split(key, 4)

    # Larger batch: exercises the tiled Pallas path, including ragged padding
    # (1000 is not a multiple of 128).
    b_large = 1000
    yt_l = jax.random.uniform(k1, (b_large,), jnp.float32, minval=250.0, maxval=350.0)
    nz_l = jax.random.uniform(k2, (b_large,), jnp.float32, minval=-0.25, maxval=0.25)
    yp_l = yt_l * (1.0 + nz_l)
    acc_l = jax.block_until_ready(temperature_accuracy10(yp_l, yt_l))
    ref_l = _reference_jnp(yp_l, yt_l)
    assert jnp.allclose(acc_l, ref_l, atol=1e-6), (acc_l, ref_l)

    # Tiny batch (matches the module's typical [batch_size] usage): fast path.
    b_small = 8
    yt_s = jax.random.uniform(k3, (b_small,), jnp.float32, minval=250.0, maxval=350.0)
    nz_s = jax.random.uniform(k4, (b_small,), jnp.float32, minval=-0.25, maxval=0.25)
    yp_s = yt_s * (1.0 + nz_s)
    acc_s = jax.block_until_ready(temperature_accuracy10(yp_s, yt_s))
    ref_s = _reference_jnp(yp_s, yt_s)
    assert jnp.allclose(acc_s, ref_s, atol=1e-6), (acc_s, ref_s)

    print("KERNEL_OK")
</pallas_src>

<mosaic_0001>
module attributes {stable_mosaic.version = 11 : i64} {
  func.func @_temp_acc_kernel(%arg0: i32, %arg1: memref<8x128xf32, #tpu.memory_space<vmem>>, %arg2: memref<8x128xf32, #tpu.memory_space<vmem>>, %arg3: memref<1x1xf32, #tpu.memory_space<vmem>>) attributes {dimension_semantics = [#tpu.dimension_semantics<arbitrary>], iteration_bounds = array<i64: 1>, scalar_prefetch = 0 : i64, scratch_operands = 0 : i64, tpu.core_type = #tpu.core_type<tc>, window_params = [{transform_indices = @transform_0, window_bounds = array<i64: 8, 128>}, {transform_indices = @transform_1, window_bounds = array<i64: 8, 128>}, {pipeline_mode = #tpu.pipeline_mode<synchronous>, transform_indices = @transform_2, window_bounds = array<i64: 1, 1>}]} {
    %c0_i32 = arith.constant 0 : i32
    %0 = arith.cmpi eq, %arg0, %c0_i32 : i32
    %1 = arith.extui %0 : i1 to i32
    %c0_i32_0 = arith.constant 0 : i32
    %2 = arith.cmpi ne, %1, %c0_i32_0 : i32
    scf.if %2 {
      %cst_11 = arith.constant 0.000000e+00 : f32
      %23 = vector.broadcast %cst_11 : f32 to vector<1x1xf32>
      %c0_12 = arith.constant 0 : index
      %c0_13 = arith.constant 0 : index
      %24 = vector.load %arg3[%c0_12, %c0_13] : memref<1x1xf32, #tpu.memory_space<vmem>>, vector<1x1xf32>
      tpu.vector_store %arg3[%c0_12, %c0_13], %23 {strides = array<i32>} : memref<1x1xf32, #tpu.memory_space<vmem>>, vector<1x1xf32>,
    } else {
    }
    %c0 = arith.constant 0 : index
    %c0_1 = arith.constant 0 : index
    %3 = vector.load %arg1[%c0, %c0_1] : memref<8x128xf32, #tpu.memory_space<vmem>>, vector<8x128xf32>
    %c0_2 = arith.constant 0 : index
    %c0_3 = arith.constant 0 : index
    %4 = vector.load %arg2[%c0_2, %c0_3] : memref<8x128xf32, #tpu.memory_space<vmem>>, vector<8x128xf32>
    %5 = arith.subf %3, %4 : vector<8x128xf32>
    %6 = math.absf %5 : vector<8x128xf32>
    %7 = arith.divf %6, %4 : vector<8x128xf32>
    %c0_4 = arith.constant 0 : index
    %c0_5 = arith.constant 0 : index
    %8 = vector.load %arg3[%c0_4, %c0_5] : memref<1x1xf32, #tpu.memory_space<vmem>>, vector<1x1xf32>
    %cst = arith.constant 1.000000e-01 : f32
    %9 = vector.broadcast %cst : f32 to vector<8x128xf32>
    %10 = arith.cmpf ogt, %7, %9 : vector<8x128xf32>
    %11 = arith.extui %10 : vector<8x128xi1> to vector<8x128xi32>
    %12 = arith.sitofp %11 : vector<8x128xi32> to vector<8x128xf32>
    %13 = vector.shape_cast %12 : vector<8x128xf32> to vector<1x8x128xf32>
    %cst_6 = arith.constant dense<0.000000e+00> : vector<1xf32>
    %14 = vector.multi_reduction <add>, %13, %cst_6 [1, 2] : vector<1x8x128xf32> to vector<1xf32>
    %15 = vector.shape_cast %14 : vector<1xf32> to vector<1x1x1xf32>
    %16 = vector.extract %15[0, 0, 0] : f32 from vector<1x1x1xf32>
    %17 = vector.broadcast %16 : f32 to vector<1x1xf32>
    %18 = arith.addf %8, %17 : vector<1x1xf32>
    %c0_7 = arith.constant 0 : index
    %c0_8 = arith.constant 0 : index
    %19 = vector.load %arg3[%c0_7, %c0_8] : memref<1x1xf32, #tpu.memory_space<vmem>>, vector<1x1xf32>
    tpu.vector_store %arg3[%c0_7, %c0_8], %18 {strides = array<i32>} : memref<1x1xf32, #tpu.memory_space<vmem>>, vector<1x1xf32>,
    %c0_i32_9 = arith.constant 0 : i32
    %20 = arith.cmpi eq, %arg0, %c0_i32_9 : i32
    %21 = arith.extui %20 : i1 to i32
    %c0_i32_10 = arith.constant 0 : i32
    %22 = arith.cmpi ne, %21, %c0_i32_10 : i32
    scf.if %22 {
      %c0_11 = arith.constant 0 : index
      %c0_12 = arith.constant 0 : index
      %23 = vector.load %arg3[%c0_11, %c0_12] : memref<1x1xf32, #tpu.memory_space<vmem>>, vector<1x1xf32>
      %cst_13 = arith.constant 1.000000e-03 : f32
      %24 = vector.broadcast %cst_13 : f32 to vector<1x1xf32>
      %25 = arith.mulf %23, %24 : vector<1x1xf32>
      %cst_14 = arith.constant 1.000000e+00 : f32
      %26 = vector.broadcast %cst_14 : f32 to vector<1x1xf32>
      %27 = arith.subf %26, %25 : vector<1x1xf32>
      %c0_15 = arith.constant 0 : index
      %c0_16 = arith.constant 0 : index
      %28 = vector.load %arg3[%c0_15, %c0_16] : memref<1x1xf32, #tpu.memory_space<vmem>>, vector<1x1xf32>
      tpu.vector_store %arg3[%c0_15, %c0_16], %27 {strides = array<i32>} : memref<1x1xf32, #tpu.memory_space<vmem>>, vector<1x1xf32>,
    } else {
    }
    return
  }
  func.func @transform_0(%arg0: i32) -> (i32, i32) {
    %c0_i32 = arith.constant 0 : i32
    %c0_i32_0 = arith.constant 0 : i32
    return %arg0, %c0_i32 : i32, i32
  }
  func.func @transform_1(%arg0: i32) -> (i32, i32) {
    %c0_i32 = arith.constant 0 : i32
    %c0_i32_0 = arith.constant 0 : i32
    return %arg0, %c0_i32 : i32, i32
  }
  func.func @transform_2(%arg0: i32) -> (i32, i32) {
    %c0_i32 = arith.constant 0 : i32
    %c0_i32_0 = arith.constant 0 : i32
    %c0_i32_1 = arith.constant 0 : i32
    return %c0_i32, %c0_i32_0 : i32, i32
  }
}

</mosaic_0001>

<bundles_post_ra>
// kernel: tpu_custom_call.1
= control target key start
LH: loop header
LB: loop body
LE: loop exit
PB: predicated region body
PF: predicated region fallthrough
CT: control target
= control target key end

     0   :  { %7 = vsyncpa [#allocation3], 0  ;;  %s227_s0 = inlined_call_operand.hbm [shape: f32[8,128], index: 0, kind: input, shape index: {}]   ;;  %s228_s1 = inlined_call_operand.hbm [shape: f32[8,128], index: 1, kind: input, shape index: {}]   ;;  %s229_s2 = inlined_call_operand.hbm [shape: f32[1,1], index: 2, kind: output, shape index: {}]  }
   0x1   :  { %8 = vsyncpa [#allocation6], 0 }
   0x2   :  { %9 = vsyncpa [#allocation4], 0  ;;  %s169_s9 = smov [#allocation2]   ;;  %s170_s11 = smov [#allocation5]  }
   0x3   :  { %s16_s10 = sshll.u32 %s169_s9, 4  ;;  %s26_s12 = sshll.u32 %s170_s11, 4  ;;  %s17_s10 = int_to_ptr.vmem [resolvable:$true] %s16_s10  ;;  %s27_s12 = int_to_ptr.vmem [resolvable:$true] %s26_s12 }
   0x4   :  { %s97_s15 = scalar_lea.hbm %s227_s0, 128 }
   0x5   :  { %p98_p0 = scmp.ne.s32.totalorder %s227_s0, %s97_s15  ;;  %p101_p1 = scmp.lt.u32.totalorder %s97_s15, %s227_s0 }
   0x7   :  { %p103_p2 = pnand %p101_p1, %p98_p0 }
   0x9   :  { %106 = shalt.err (!%p103_p2)
}
   0xa   :  { %s107_s20 = scalar_lea.vmem %s17_s10, 128  ;;  %p112_p4 = scmp.lt.s32.totalorder %s17_s10, %s17_s10 }
   0xb   :  { %p108_p3 = scmp.ne.s32.totalorder %s17_s10, %s107_s20  ;;  %p113_p5 = scmp.lt.s32.totalorder %s107_s20, %s107_s20 }
   0xd   :  { %p114_p6 = por %p113_p5, %p112_p4 }
   0xf   :  { %p115_p7 = pnand %p114_p6, %p108_p3 }
  0x11   :  { %118 = shalt.err (!%p115_p7)
}
  0x12   :  { %19 = dma.hbm_to_vmem [thread:$0]  %s227_s0, 128, %s17_s10, [#allocation3]  }
  0x13   :  { %s119_s25 = scalar_lea.hbm %s228_s1, 128 }
  0x14   :  { %p120_p8 = scmp.ne.s32.totalorder %s228_s1, %s119_s25  ;;  %p123_p9 = scmp.lt.u32.totalorder %s119_s25, %s228_s1 }
  0x16   :  { %p125_p10 = pnand %p123_p9, %p120_p8 }
  0x18   :  { %128 = shalt.err (!%p125_p10)
}
  0x19   :  { %s129_s30 = scalar_lea.vmem %s27_s12, 128  ;;  %p134_p12 = scmp.lt.s32.totalorder %s27_s12, %s27_s12 }
  0x1a   :  { %p130_p11 = scmp.ne.s32.totalorder %s27_s12, %s129_s30  ;;  %p135_p13 = scmp.lt.s32.totalorder %s129_s30, %s129_s30 }
  0x1c   :  { %p136_p0 = por %p135_p13, %p134_p12 }
  0x1e   :  { %p137_p1 = pnand %p136_p0, %p130_p11 }
  0x20   :  { %140 = shalt.err (!%p137_p1)
}
  0x21   :  { %29 = dma.hbm_to_vmem [thread:$0]  %s228_s1, 128, %s27_s12, [#allocation6]  }
  0x22   :  { %163 = dma.done.wait [#allocation3], 128  }
  0x23   :  { %164 = vsyncadd [#allocation3], 4294967168 }
  0x24   :  { %165 = dma.done.wait [#allocation6], 128  }
  0x25   :  { %166 = vsyncadd [#allocation6], 4294967168  ;;  %vm40_vm0 = vcmask 0   ;;  %v171_v0 = vmov 0.0   ;;  %v43_v1 = vld [vmem:[#allocation5] sm:$0xff]  ;;  %v42_v2 = vld [vmem:[#allocation2] sm:$0xff] }
  0x26   :  { %41 = vst.msk [vmem:[#allocation7] sm:$0x1] %vm40_vm0, %v171_v0  ;;  %95 = vrcp.f32 %v43_v1  ;;  %v44_v3 = vsub.f32 %v42_v2, %v43_v1  ;;  %s172_s4 = smov [#allocation7]  }
  0x27   :  { %s78_s5 = sshll.u32 %s172_s4, 4  ;;  %s79_s5 = int_to_ptr.vmem [resolvable:$true] %s78_s5 }
  0x28   :  { %v45_v4 = vand.u32 2147483647, %v44_v3  ;;  %s141_s6 = scalar_lea.vmem %s79_s5, 16  ;;  %s145_s7 = scalar_lea.vmem %s79_s5, 32 }
  0x29   :  { %p142_p2 = scmp.ne.s32.totalorder %s79_s5, %s141_s6  ;;  %p146_p3 = scmp.lt.s32.totalorder %s79_s5, %s79_s5 }
  0x2a   :  { %p147_p4 = scmp.lt.s32.totalorder %s145_s7, %s141_s6 }
  0x2c   :  { %p148_p5 = por %p147_p4, %p146_p3 }
  0x2d   :  { %v48_v15 = vld [vmem:[#allocation7] sm:$0x1] }
  0x2e   :  { %p149_p6 = pnand %p148_p5, %p142_p2 }
  0x30   :  { %v96_v5 = vpop.eup %95 }
  0x31   :  { %v47_v6 = vmul.f32 %v96_v5, %v45_v4 }
  0x33   :  { %vm49_vm1 = vcmp.gt.f32.partialorder %v47_v6, 0.1 }
  0x34   :  { %v88_v7 = vsel %vm49_vm1, 1.0, %v171_v0 }
  0x35   :  { %52 = vadd.xlane.f32.xlu0 %v88_v7 }
  0xc2   :  { %v53_v8 = vpop.xlane.xlu0 %52 }
  0xc3   :  { %v54_v9 = vrot.slane %v53_v8, 4 }
  0xc5   :  { %v55_v10 = vadd.f32 %v54_v9, %v53_v8 }
  0xc7   :  { %v56_v11 = vrot.slane %v55_v10, 2 }
  0xc9   :  { %v57_v12 = vadd.f32 %v56_v11, %v55_v10 }
  0xcb   :  { %v58_v13 = vrot.slane %v57_v12, 1 }
  0xcd   :  { %v59_v14 = vadd.f32 %v58_v13, %v57_v12 }
  0xcf   :  { %89 = vpush %v59_v14 }
 0x100   :  { %s90_s1 = spop %89 }
 0x101   :  { %v61_v16 = vstv %s90_s1 }
 0x102   :  { %v62_v17 = vadd.f32 %v61_v16, %v48_v15 }
 0x104   :  { %64 = vst.msk [vmem:[#allocation7] sm:$0x1] %vm40_vm0, %v62_v17 }
 0x10b   :  { %v68_v18 = vld [vmem:[#allocation7] sm:$0x1] }
 0x10c   :  { %v69_v19 = vmul.f32 0.001, %v68_v18 }
 0x10e   :  { %v70_v20 = vsub.f32 1.0, %v69_v19 }
 0x110   :  { %71 = vst.msk [vmem:[#allocation7] sm:$0x1] %vm40_vm0, %v70_v20 }
 0x111   :  { %152 = shalt.err (!%p149_p6)
}
 0x112   :  { %s153_s10 = scalar_lea.hbm %s229_s2, 16 }
 0x113   :  { %p154_p7 = scmp.ne.s32.totalorder %s229_s2, %s153_s10  ;;  %p157_p8 = scmp.lt.u32.totalorder %s153_s10, %s229_s2 }
 0x115   :  { %p159_p9 = pnand %p157_p8, %p154_p7 }
 0x117   :  { %162 = shalt.err (!%p159_p9)
}
 0x118   :  { %81 = dma.vmem_to_hbm [thread:$0]  %s79_s5, 16, %s229_s2, [#allocation4]  }
 0x119   :  { %167 = dma.done.wait [#allocation4], 16  }
 0x11a   :  { %168 = vsyncadd [#allocation4], 4294967280 }
 0x11b   :  { %85 = vsyncpa [#allocation3], 1 }
 0x11c   :  { %86 = vsyncpa [#allocation6], 1 }
 0x11d   :  { %87 = vsyncpa [#allocation4], 1 }

</bundles_post_ra>
